<compile_context>
chip_gen: v7x
topology: tpu7x:2x2x1
jax: 0.10.0
libtpu: 0.0.40
codegen_flags: <defaults>
</compile_context>

<pallas_src>
import functools

import jax
import jax.numpy as jnp
from jax.experimental import pallas as pl
from jax.experimental.pallas import tpu as pltpu

_LANE = 128


def _matmul_bias_act_kernel(a_ref, b_ref, bias_ref, o_ref, acc_ref, *, relu):
    """acc += A_tile @ B_tile ; at the last K step: out = act(acc + bias)."""

    @pl.when(pl.program_id(2) == 0)
    def _init():
        acc_ref[...] = jnp.zeros_like(acc_ref)

    acc_ref[...] += jnp.dot(a_ref[...], b_ref[...],
                            preferred_element_type=jnp.float32)

    @pl.when(pl.program_id(2) == pl.num_programs(2) - 1)
    def _finalize():
        r = acc_ref[...] + bias_ref[...]          # f32 accumulate + f32 bias
        if relu:
            r = jnp.maximum(r, 0.0)
        o_ref[...] = r.astype(o_ref.dtype)


def _pick_tile(dim, cap):
    """Largest multiple-of-128 tile <= cap that divides dim (dim % 128 == 0)."""
    t = min(dim, cap)
    while dim % t:
        t -= _LANE
    return t


def _tiled_matmul(a, b, bias, *, relu, out_dtype,
                  tm_cap=256, tn_cap=512, tk_cap=512):
    """out = act(a @ b + bias); a:[M,K] bf16, b:[K,N] bf16, bias:[1,N] f32."""
    m, k = a.shape
    k2, n = b.shape
    assert k == k2
    tm = _pick_tile(m, tm_cap)
    tn = _pick_tile(n, tn_cap)
    tk = _pick_tile(k, tk_cap)
    grid = (m // tm, n // tn, k // tk)
    kernel = functools.partial(_matmul_bias_act_kernel, relu=relu)
    return pl.pallas_call(
        kernel,
        out_shape=jax.ShapeDtypeStruct((m, n), out_dtype),
        grid=grid,
        in_specs=[
            pl.BlockSpec((tm, tk), lambda i, j, kk: (i, kk)),
            pl.BlockSpec((tk, tn), lambda i, j, kk: (kk, j)),
            pl.BlockSpec((1, tn), lambda i, j, kk: (0, j)),
        ],
        out_specs=pl.BlockSpec((tm, tn), lambda i, j, kk: (i, j)),
        scratch_shapes=[pltpu.VMEM((tm, tn), jnp.float32)],
        compiler_params=pltpu.CompilerParams(
            dimension_semantics=("parallel", "parallel", "arbitrary")),
    )(a, b, bias)


def _round_up(v, m):
    return ((v + m - 1) // m) * m


def _pad_to(arr, shape, dtype):
    pads = [(0, t - s) for s, t in zip(arr.shape, shape)]
    return jnp.pad(arr, pads).astype(dtype)


def _build_a_hat(edge_index, num_nodes):
    """Dense A_hat = D^-1/2 (A + I) D^-1/2 (plain JAX glue)."""
    src = edge_index[0]
    dst = edge_index[1]
    loop = jnp.arange(num_nodes, dtype=edge_index.dtype)
    src = jnp.concatenate([src, loop])
    dst = jnp.concatenate([dst, loop])
    adj = jnp.zeros((num_nodes, num_nodes), jnp.float32).at[dst, src].add(1.0)
    deg = jnp.sum(adj, axis=1)                      # in-degree incl. self loop
    dinv = jnp.where(deg > 0, 1.0 / jnp.sqrt(deg), 0.0)
    return dinv[:, None] * adj * dinv[None, :]      # [N, N]


@functools.partial(jax.jit, static_argnames=("num_nodes",))
def simple_gcn_forward(x, edge_index, params, *, num_nodes):
    w1, b1, w2, b2 = params["w1"], params["b1"], params["w2"], params["b2"]

    n, f = x.shape
    h = w1.shape[0]          # hidden_channels  (w1 is [out, in] like PyTorch)
    c = w2.shape[0]          # num_classes

    a_hat = _build_a_hat(edge_index, num_nodes)

    # ---- pad everything to lane-dense (multiple-of-128) shapes, cast bf16 ----
    np_ = _round_up(num_nodes, _LANE)
    fp = _round_up(f, _LANE)
    hp = _round_up(h, _LANE)
    cp = _round_up(c, _LANE)

    a_p = _pad_to(a_hat, (np_, np_), jnp.bfloat16)
    x_p = _pad_to(x, (np_, fp), jnp.bfloat16)
    w1_p = _pad_to(w1.T, (fp, hp), jnp.bfloat16)     # [in, out]
    w2_p = _pad_to(w2.T, (hp, cp), jnp.bfloat16)     # [in, out]
    b1_p = _pad_to(b1.reshape(1, h), (1, hp), jnp.float32)
    b2_p = _pad_to(b2.reshape(1, c), (1, cp), jnp.float32)
    zero_h = jnp.zeros((1, hp), jnp.float32)
    zero_c = jnp.zeros((1, cp), jnp.float32)

    # ---- layer 1: relu(A_hat @ (X @ W1^T) + b1) ----
    t1 = _tiled_matmul(x_p, w1_p, zero_h, relu=False, out_dtype=jnp.bfloat16)
    h1 = _tiled_matmul(a_p, t1, b1_p, relu=True, out_dtype=jnp.bfloat16)
    # dropout(p=0.31): eval-mode identity (see TODO at top)

    # ---- layer 2: A_hat @ (H @ W2^T) + b2 ----
    t2 = _tiled_matmul(h1, w2_p, zero_c, relu=False, out_dtype=jnp.bfloat16)
    out = _tiled_matmul(a_p, t2, b2_p, relu=False, out_dtype=jnp.float32)

    return out[:num_nodes, :c]


def _reference_forward(x, edge_index, params, num_nodes):
    """Pure-JAX f32 reference (eval-mode dropout)."""
    a_hat = _build_a_hat(edge_index, num_nodes)
    h = a_hat @ (x @ params["w1"].T) + params["b1"]
    h = jnp.maximum(h, 0.0)
    return a_hat @ (h @ params["w2"].T) + params["b2"]


def init_params(key, num_features, num_classes, hidden_channels):
    """Deterministic glorot-style init matching GCNConv parameter shapes."""
    k1, k2 = jax.random.split(key)

    def glorot(k, out_dim, in_dim):
        limit = jnp.sqrt(6.0 / (in_dim + out_dim))
        return jax.random.uniform(k, (out_dim, in_dim), jnp.float32,
                                  minval=-limit, maxval=limit)

    return {
        "w1": glorot(k1, hidden_channels, num_features),   # [H, F]
        "b1": jnp.zeros((hidden_channels,), jnp.float32),
        "w2": glorot(k2, num_classes, hidden_channels),    # [C, H]
        "b2": jnp.zeros((num_classes,), jnp.float32),
    }


if __name__ == "__main__":
    num_nodes = 16
    num_features = 8
    hidden_channels = 32
    num_classes = 4
    num_edges = 40

    key = jax.random.PRNGKey(0)
    kx, ke, kp = jax.random.split(key, 3)

    x = jax.random.normal(kx, (num_nodes, num_features), jnp.float32)
    edge_index = jax.random.randint(ke, (2, num_edges), 0, num_nodes,
                                    dtype=jnp.int32)
    params = init_params(kp, num_features, num_classes, hidden_channels)

    out = simple_gcn_forward(x, edge_index, params, num_nodes=num_nodes)
    out = jax.block_until_ready(out)

    assert out.shape == (num_nodes, num_classes)
    assert bool(jnp.all(jnp.isfinite(out)))

    ref = _reference_forward(x, edge_index, params, num_nodes)
    max_err = float(jnp.max(jnp.abs(out - ref)))
    assert bool(jnp.allclose(out, ref, atol=5e-2, rtol=5e-2)), max_err

    print("KERNEL_OK")
</pallas_src>

<mosaic_0001>
module attributes {stable_mosaic.version = 11 : i64} {
  func.func @_matmul_bias_act_kernel(%arg0: i32, %arg1: i32, %arg2: i32, %arg3: memref<128x128xbf16, #tpu.memory_space<vmem>>, %arg4: memref<128x128xbf16, #tpu.memory_space<vmem>>, %arg5: memref<1x128xf32, #tpu.memory_space<vmem>>, %arg6: memref<128x128xbf16, #tpu.memory_space<vmem>>, %arg7: memref<128x128xf32, #tpu.memory_space<vmem>>) attributes {dimension_semantics = [#tpu.dimension_semantics<parallel>, #tpu.dimension_semantics<parallel>, #tpu.dimension_semantics<arbitrary>], iteration_bounds = array<i64: 1, 1, 1>, scalar_prefetch = 0 : i64, scratch_operands = 1 : i64, tpu.core_type = #tpu.core_type<tc>, window_params = [{transform_indices = @transform_0, window_bounds = array<i64: 128, 128>}, {transform_indices = @transform_1, window_bounds = array<i64: 128, 128>}, {transform_indices = @transform_2, window_bounds = array<i64: 1, 128>}, {transform_indices = @transform_3, window_bounds = array<i64: 128, 128>}]} {
    %c0_i32 = arith.constant 0 : i32
    %0 = arith.cmpi eq, %arg2, %c0_i32 : i32
    %1 = arith.extui %0 : i1 to i32
    %c0_i32_0 = arith.constant 0 : i32
    %2 = arith.cmpi ne, %1, %c0_i32_0 : i32
    scf.if %2 {
      %cst_10 = arith.constant 0.000000e+00 : f32
      %12 = vector.broadcast %cst_10 : f32 to vector<128x128xf32>
      %c0_11 = arith.constant 0 : index
      %c0_12 = arith.constant 0 : index
      %13 = vector.load %arg7[%c0_11, %c0_12] : memref<128x128xf32, #tpu.memory_space<vmem>>, vector<128x128xf32>
      tpu.vector_store %arg7[%c0_11, %c0_12], %12 {strides = array<i32>} : memref<128x128xf32, #tpu.memory_space<vmem>>, vector<128x128xf32>,
    } else {
    }
    %c0 = arith.constant 0 : index
    %c0_1 = arith.constant 0 : index
    %3 = vector.load %arg7[%c0, %c0_1] : memref<128x128xf32, #tpu.memory_space<vmem>>, vector<128x128xf32>
    %c0_2 = arith.constant 0 : index
    %c0_3 = arith.constant 0 : index
    %4 = vector.load %arg3[%c0_2, %c0_3] : memref<128x128xbf16, #tpu.memory_space<vmem>>, vector<128x128xbf16>
    %c0_4 = arith.constant 0 : index
    %c0_5 = arith.constant 0 : index
    %5 = vector.load %arg4[%c0_4, %c0_5] : memref<128x128xbf16, #tpu.memory_space<vmem>>, vector<128x128xbf16>
    %cst = arith.constant dense<0.000000e+00> : vector<128x128xf32>
    %6 = tpu.matmul %4, %5, %cst {dimension_numbers = #tpu.dot_dimension_numbers<[1], [0], [0], [1], [0, 0, 1, 1], [], []>} : vector<128x128xbf16>, vector<128x128xbf16>, vector<128x128xf32> -> vector<128x128xf32>
    %7 = arith.addf %3, %6 : vector<128x128xf32>
    %c0_6 = arith.constant 0 : index
    %c0_7 = arith.constant 0 : index
    %8 = vector.load %arg7[%c0_6, %c0_7] : memref<128x128xf32, #tpu.memory_space<vmem>>, vector<128x128xf32>
    tpu.vector_store %arg7[%c0_6, %c0_7], %7 {strides = array<i32>} : memref<128x128xf32, #tpu.memory_space<vmem>>, vector<128x128xf32>,
    %c0_i32_8 = arith.constant 0 : i32
    %9 = arith.cmpi eq, %arg2, %c0_i32_8 : i32
    %10 = arith.extui %9 : i1 to i32
    %c0_i32_9 = arith.constant 0 : i32
    %11 = arith.cmpi ne, %10, %c0_i32_9 : i32
    scf.if %11 {
      %c0_10 = arith.constant 0 : index
      %c0_11 = arith.constant 0 : index
      %12 = vector.load %arg7[%c0_10, %c0_11] : memref<128x128xf32, #tpu.memory_space<vmem>>, vector<128x128xf32>
      %c0_12 = arith.constant 0 : index
      %c0_13 = arith.constant 0 : index
      %13 = vector.load %arg5[%c0_12, %c0_13] : memref<1x128xf32, #tpu.memory_space<vmem>>, vector<1x128xf32>
      %14 = vector.broadcast %13 : vector<1x128xf32> to vector<128x128xf32>
      %15 = arith.addf %12, %14 : vector<128x128xf32>
      %16 = arith.truncf %15 : vector<128x128xf32> to vector<128x128xbf16>
      %c0_14 = arith.constant 0 : index
      %c0_15 = arith.constant 0 : index
      %17 = vector.load %arg6[%c0_14, %c0_15] : memref<128x128xbf16, #tpu.memory_space<vmem>>, vector<128x128xbf16>
      tpu.vector_store %arg6[%c0_14, %c0_15], %16 {strides = array<i32>} : memref<128x128xbf16, #tpu.memory_space<vmem>>, vector<128x128xbf16>,
    } else {
    }
    return
  }
  func.func @transform_0(%arg0: i32, %arg1: i32, %arg2: i32) -> (i32, i32) {
    %c0_i32 = arith.constant 0 : i32
    return %arg0, %arg2 : i32, i32
  }
  func.func @transform_1(%arg0: i32, %arg1: i32, %arg2: i32) -> (i32, i32) {
    %c0_i32 = arith.constant 0 : i32
    return %arg2, %arg1 : i32, i32
  }
  func.func @transform_2(%arg0: i32, %arg1: i32, %arg2: i32) -> (i32, i32) {
    %c0_i32 = arith.constant 0 : i32
    %c0_i32_0 = arith.constant 0 : i32
    return %c0_i32, %arg1 : i32, i32
  }
  func.func @transform_3(%arg0: i32, %arg1: i32, %arg2: i32) -> (i32, i32) {
    %c0_i32 = arith.constant 0 : i32
    return %arg0, %arg1 : i32, i32
  }
}

module attributes {stable_mosaic.version = 11 : i64} {
  func.func @_matmul_bias_act_kernel(%arg0: i32, %arg1: i32, %arg2: i32, %arg3: memref<128x128xbf16, #tpu.memory_space<vmem>>, %arg4: memref<128x128xbf16, #tpu.memory_space<vmem>>, %arg5: memref<1x128xf32, #tpu.memory_space<vmem>>, %arg6: memref<128x128xbf16, #tpu.memory_space<vmem>>, %arg7: memref<128x128xf32, #tpu.memory_space<vmem>>) attributes {dimension_semantics = [#tpu.dimension_semantics<parallel>, #tpu.dimension_semantics<parallel>, #tpu.dimension_semantics<arbitrary>], iteration_bounds = array<i64: 1, 1, 1>, scalar_prefetch = 0 : i64, scratch_operands = 1 : i64, tpu.core_type = #tpu.core_type<tc>, window_params = [{transform_indices = @transform_0, window_bounds = array<i64: 128, 128>}, {transform_indices = @transform_1, window_bounds = array<i64: 128, 128>}, {transform_indices = @transform_2, window_bounds = array<i64: 1, 128>}, {transform_indices = @transform_3, window_bounds = array<i64: 128, 128>}]} {
    %c0_i32 = arith.constant 0 : i32
    %0 = arith.cmpi eq, %arg2, %c0_i32 : i32
    %1 = arith.extui %0 : i1 to i32
    %c0_i32_0 = arith.constant 0 : i32
    %2 = arith.cmpi ne, %1, %c0_i32_0 : i32
    scf.if %2 {
      %cst_10 = arith.constant 0.000000e+00 : f32
      %12 = vector.broadcast %cst_10 : f32 to vector<128x128xf32>
      %c0_11 = arith.constant 0 : index
      %c0_12 = arith.constant 0 : index
      %13 = vector.load %arg7[%c0_11, %c0_12] : memref<128x128xf32, #tpu.memory_space<vmem>>, vector<128x128xf32>
      tpu.vector_store %arg7[%c0_11, %c0_12], %12 {strides = array<i32>} : memref<128x128xf32, #tpu.memory_space<vmem>>, vector<128x128xf32>,
    } else {
    }
    %c0 = arith.constant 0 : index
    %c0_1 = arith.constant 0 : index
    %3 = vector.load %arg7[%c0, %c0_1] : memref<128x128xf32, #tpu.memory_space<vmem>>, vector<128x128xf32>
    %c0_2 = arith.constant 0 : index
    %c0_3 = arith.constant 0 : index
    %4 = vector.load %arg3[%c0_2, %c0_3] : memref<128x128xbf16, #tpu.memory_space<vmem>>, vector<128x128xbf16>
    %c0_4 = arith.constant 0 : index
    %c0_5 = arith.constant 0 : index
    %5 = vector.load %arg4[%c0_4, %c0_5] : memref<128x128xbf16, #tpu.memory_space<vmem>>, vector<128x128xbf16>
    %cst = arith.constant dense<0.000000e+00> : vector<128x128xf32>
    %6 = tpu.matmul %4, %5, %cst {dimension_numbers = #tpu.dot_dimension_numbers<[1], [0], [0], [1], [0, 0, 1, 1], [], []>} : vector<128x128xbf16>, vector<128x128xbf16>, vector<128x128xf32> -> vector<128x128xf32>
    %7 = arith.addf %3, %6 : vector<128x128xf32>
    %c0_6 = arith.constant 0 : index
    %c0_7 = arith.constant 0 : index
    %8 = vector.load %arg7[%c0_6, %c0_7] : memref<128x128xf32, #tpu.memory_space<vmem>>, vector<128x128xf32>
    tpu.vector_store %arg7[%c0_6, %c0_7], %7 {strides = array<i32>} : memref<128x128xf32, #tpu.memory_space<vmem>>, vector<128x128xf32>,
    %c0_i32_8 = arith.constant 0 : i32
    %9 = arith.cmpi eq, %arg2, %c0_i32_8 : i32
    %10 = arith.extui %9 : i1 to i32
    %c0_i32_9 = arith.constant 0 : i32
    %11 = arith.cmpi ne, %10, %c0_i32_9 : i32
    scf.if %11 {
      %c0_10 = arith.constant 0 : index
      %c0_11 = arith.constant 0 : index
      %12 = vector.load %arg7[%c0_10, %c0_11] : memref<128x128xf32, #tpu.memory_space<vmem>>, vector<128x128xf32>
      %c0_12 = arith.constant 0 : index
      %c0_13 = arith.constant 0 : index
      %13 = vector.load %arg5[%c0_12, %c0_13] : memref<1x128xf32, #tpu.memory_space<vmem>>, vector<1x128xf32>
      %14 = vector.broadcast %13 : vector<1x128xf32> to vector<128x128xf32>
      %15 = arith.addf %12, %14 : vector<128x128xf32>
      %cst_14 = arith.constant 0.000000e+00 : f32
      %16 = vector.broadcast %cst_14 : f32 to vector<128x128xf32>
      %17 = arith.maximumf %15, %16 : vector<128x128xf32>
      %18 = arith.truncf %17 : vector<128x128xf32> to vector<128x128xbf16>
      %c0_15 = arith.constant 0 : index
      %c0_16 = arith.constant 0 : index
      %19 = vector.load %arg6[%c0_15, %c0_16] : memref<128x128xbf16, #tpu.memory_space<vmem>>, vector<128x128xbf16>
      tpu.vector_store %arg6[%c0_15, %c0_16], %18 {strides = array<i32>} : memref<128x128xbf16, #tpu.memory_space<vmem>>, vector<128x128xbf16>,
    } else {
    }
    return
  }
  func.func @transform_0(%arg0: i32, %arg1: i32, %arg2: i32) -> (i32, i32) {
    %c0_i32 = arith.constant 0 : i32
    return %arg0, %arg2 : i32, i32
  }
  func.func @transform_1(%arg0: i32, %arg1: i32, %arg2: i32) -> (i32, i32) {
    %c0_i32 = arith.constant 0 : i32
    return %arg2, %arg1 : i32, i32
  }
  func.func @transform_2(%arg0: i32, %arg1: i32, %arg2: i32) -> (i32, i32) {
    %c0_i32 = arith.constant 0 : i32
    %c0_i32_0 = arith.constant 0 : i32
    return %c0_i32, %arg1 : i32, i32
  }
  func.func @transform_3(%arg0: i32, %arg1: i32, %arg2: i32) -> (i32, i32) {
    %c0_i32 = arith.constant 0 : i32
    return %arg0, %arg1 : i32, i32
  }
}

module attributes {stable_mosaic.version = 11 : i64} {
  func.func @_matmul_bias_act_kernel(%arg0: i32, %arg1: i32, %arg2: i32, %arg3: memref<128x128xbf16, #tpu.memory_space<vmem>>, %arg4: memref<128x128xbf16, #tpu.memory_space<vmem>>, %arg5: memref<1x128xf32, #tpu.memory_space<vmem>>, %arg6: memref<128x128xf32, #tpu.memory_space<vmem>>, %arg7: memref<128x128xf32, #tpu.memory_space<vmem>>) attributes {dimension_semantics = [#tpu.dimension_semantics<parallel>, #tpu.dimension_semantics<parallel>, #tpu.dimension_semantics<arbitrary>], iteration_bounds = array<i64: 1, 1, 1>, scalar_prefetch = 0 : i64, scratch_operands = 1 : i64, tpu.core_type = #tpu.core_type<tc>, window_params = [{transform_indices = @transform_0, window_bounds = array<i64: 128, 128>}, {transform_indices = @transform_1, window_bounds = array<i64: 128, 128>}, {transform_indices = @transform_2, window_bounds = array<i64: 1, 128>}, {transform_indices = @transform_3, window_bounds = array<i64: 128, 128>}]} {
    %c0_i32 = arith.constant 0 : i32
    %0 = arith.cmpi eq, %arg2, %c0_i32 : i32
    %1 = arith.extui %0 : i1 to i32
    %c0_i32_0 = arith.constant 0 : i32
    %2 = arith.cmpi ne, %1, %c0_i32_0 : i32
    scf.if %2 {
      %cst_10 = arith.constant 0.000000e+00 : f32
      %12 = vector.broadcast %cst_10 : f32 to vector<128x128xf32>
      %c0_11 = arith.constant 0 : index
      %c0_12 = arith.constant 0 : index
      %13 = vector.load %arg7[%c0_11, %c0_12] : memref<128x128xf32, #tpu.memory_space<vmem>>, vector<128x128xf32>
      tpu.vector_store %arg7[%c0_11, %c0_12], %12 {strides = array<i32>} : memref<128x128xf32, #tpu.memory_space<vmem>>, vector<128x128xf32>,
    } else {
    }
    %c0 = arith.constant 0 : index
    %c0_1 = arith.constant 0 : index
    %3 = vector.load %arg7[%c0, %c0_1] : memref<128x128xf32, #tpu.memory_space<vmem>>, vector<128x128xf32>
    %c0_2 = arith.constant 0 : index
    %c0_3 = arith.constant 0 : index
    %4 = vector.load %arg3[%c0_2, %c0_3] : memref<128x128xbf16, #tpu.memory_space<vmem>>, vector<128x128xbf16>
    %c0_4 = arith.constant 0 : index
    %c0_5 = arith.constant 0 : index
    %5 = vector.load %arg4[%c0_4, %c0_5] : memref<128x128xbf16, #tpu.memory_space<vmem>>, vector<128x128xbf16>
    %cst = arith.constant dense<0.000000e+00> : vector<128x128xf32>
    %6 = tpu.matmul %4, %5, %cst {dimension_numbers = #tpu.dot_dimension_numbers<[1], [0], [0], [1], [0, 0, 1, 1], [], []>} : vector<128x128xbf16>, vector<128x128xbf16>, vector<128x128xf32> -> vector<128x128xf32>
    %7 = arith.addf %3, %6 : vector<128x128xf32>
    %c0_6 = arith.constant 0 : index
    %c0_7 = arith.constant 0 : index
    %8 = vector.load %arg7[%c0_6, %c0_7] : memref<128x128xf32, #tpu.memory_space<vmem>>, vector<128x128xf32>
    tpu.vector_store %arg7[%c0_6, %c0_7], %7 {strides = array<i32>} : memref<128x128xf32, #tpu.memory_space<vmem>>, vector<128x128xf32>,
    %c0_i32_8 = arith.constant 0 : i32
    %9 = arith.cmpi eq, %arg2, %c0_i32_8 : i32
    %10 = arith.extui %9 : i1 to i32
    %c0_i32_9 = arith.constant 0 : i32
    %11 = arith.cmpi ne, %10, %c0_i32_9 : i32
    scf.if %11 {
      %c0_10 = arith.constant 0 : index
      %c0_11 = arith.constant 0 : index
      %12 = vector.load %arg7[%c0_10, %c0_11] : memref<128x128xf32, #tpu.memory_space<vmem>>, vector<128x128xf32>
      %c0_12 = arith.constant 0 : index
      %c0_13 = arith.constant 0 : index
      %13 = vector.load %arg5[%c0_12, %c0_13] : memref<1x128xf32, #tpu.memory_space<vmem>>, vector<1x128xf32>
      %14 = vector.broadcast %13 : vector<1x128xf32> to vector<128x128xf32>
      %15 = arith.addf %12, %14 : vector<128x128xf32>
      %c0_14 = arith.constant 0 : index
      %c0_15 = arith.constant 0 : index
      %16 = vector.load %arg6[%c0_14, %c0_15] : memref<128x128xf32, #tpu.memory_space<vmem>>, vector<128x128xf32>
      tpu.vector_store %arg6[%c0_14, %c0_15], %15 {strides = array<i32>} : memref<128x128xf32, #tpu.memory_space<vmem>>, vector<128x128xf32>,
    } else {
    }
    return
  }
  func.func @transform_0(%arg0: i32, %arg1: i32, %arg2: i32) -> (i32, i32) {
    %c0_i32 = arith.constant 0 : i32
    return %arg0, %arg2 : i32, i32
  }
  func.func @transform_1(%arg0: i32, %arg1: i32, %arg2: i32) -> (i32, i32) {
    %c0_i32 = arith.constant 0 : i32
    return %arg2, %arg1 : i32, i32
  }
  func.func @transform_2(%arg0: i32, %arg1: i32, %arg2: i32) -> (i32, i32) {
    %c0_i32 = arith.constant 0 : i32
    %c0_i32_0 = arith.constant 0 : i32
    return %c0_i32, %arg1 : i32, i32
  }
  func.func @transform_3(%arg0: i32, %arg1: i32, %arg2: i32) -> (i32, i32) {
    %c0_i32 = arith.constant 0 : i32
    return %arg0, %arg1 : i32, i32
  }
}

</mosaic_0001>

<bundles_post_ra>
// kernel: simple_gcn_forward.5
= control target key start
LH: loop header
LB: loop body
LE: loop exit
PB: predicated region body
PF: predicated region fallthrough
CT: control target
= control target key end

     0   :  { %s721_s1 = inlined_call_operand.vmem [shape: bf16[128,128], index: 1, kind: input, shape index: {}]   ;;  %s722_s0 = inlined_call_operand.vmem [shape: bf16[128,128], index: 0, kind: input, shape index: {}]   ;;  %s723_s2 = inlined_call_operand.vmem [shape: f32[1,128], index: 2, kind: input, shape index: {}]   ;;  %s724_s3 = inlined_call_operand.vmem [shape: bf16[128,128], index: 3, kind: output, shape index: {}]  }
   0x1   :  { %v610_v0 = vld [vmem:[%s721_s1] sm:$0xff]   ;;  %v611_v1 = vld [vmem:[%s721_s1 + $0x8] sm:$0xff]   ;;  %v612_v2 = vld [vmem:[%s721_s1 + $0x10] sm:$0xff]  }
   0x2   :  { %562 = vmatprep.subr.bf16.mxu0 %v610_v0  ;;  %594 = vmatprep.subr.bf16.mxu1 %v610_v0  ;;  %v613_v3 = vld [vmem:[%s721_s1 + $0x18] sm:$0xff]   ;;  %v618_v4 = vld [vmem:[%s722_s0] sm:$0xff]   ;;  %v615_v7 = vld [vmem:[%s721_s1 + $0x28] sm:$0xff]  }
   0x3   :  { %563 = vmatpush3.bf16.msra.mxu0 %v610_v0  ;;  %602 = vmatpush3.bf16.msra.mxu1 %v610_v0  ;;  %v619_v5 = vld [vmem:[%s722_s0 + $0x20] sm:$0xff]   ;;  %v616_v8 = vld [vmem:[%s721_s1 + $0x30] sm:$0xff]   ;;  %v617_v9 = vld [vmem:[%s721_s1 + $0x38] sm:$0xff]  }
   0x4   :  { %564 = vmatprep.subr.bf16.mxu0 %v611_v1  ;;  %595 = vmatprep.subr.bf16.mxu1 %v611_v1  ;;  %v614_v6 = vld [vmem:[%s721_s1 + $0x20] sm:$0xff]   ;;  %v620_v10 = vld [vmem:[%s722_s0 + $0x8] sm:$0xff]   ;;  %v622_v12 = vld [vmem:[%s722_s0 + $0x10] sm:$0xff]  }
   0x5   :  { %578 = vmatprep.mubr.bf16.mxu0 %v618_v4  ;;  %586 = vmatprep.mubr.bf16.mxu1 %v619_v5  ;;  %v621_v11 = vld [vmem:[%s722_s0 + $0x28] sm:$0xff]   ;;  %v623_v13 = vld [vmem:[%s722_s0 + $0x30] sm:$0xff]   ;;  %v624_v14 = vld [vmem:[%s722_s0 + $0x18] sm:$0xff]  }
   0x6   :  { %v625_v15 = vld [vmem:[%s722_s0 + $0x38] sm:$0xff]   ;;  %v466_v16 = vld [vmem:[%s723_s2] ss:$0 sm:$0xff] }
   0x7   :  { %565 = vmatpush3.bf16.msra.mxu0 %v611_v1  ;;  %603 = vmatpush3.bf16.msra.mxu1 %v611_v1 }
   0x8   :  { %566 = vmatprep.subr.bf16.mxu0 %v612_v2  ;;  %596 = vmatprep.subr.bf16.mxu1 %v612_v2 }
   0xb   :  { %567 = vmatpush3.bf16.msra.mxu0 %v612_v2  ;;  %604 = vmatpush3.bf16.msra.mxu1 %v612_v2 }
   0xc   :  { %568 = vmatprep.subr.bf16.mxu0 %v613_v3  ;;  %597 = vmatprep.subr.bf16.mxu1 %v613_v3 }
   0xf   :  { %569 = vmatpush3.bf16.msra.mxu0 %v613_v3  ;;  %605 = vmatpush3.bf16.msra.mxu1 %v613_v3 }
  0x10   :  { %570 = vmatprep.subr.bf16.mxu0 %v614_v6  ;;  %598 = vmatprep.subr.bf16.mxu1 %v614_v6 }
  0x13   :  { %571 = vmatpush3.bf16.msra.mxu0 %v614_v6  ;;  %606 = vmatpush3.bf16.msra.mxu1 %v614_v6 }
  0x14   :  { %572 = vmatprep.subr.bf16.mxu0 %v615_v7  ;;  %599 = vmatprep.subr.bf16.mxu1 %v615_v7 }
  0x17   :  { %573 = vmatpush3.bf16.msra.mxu0 %v615_v7  ;;  %607 = vmatpush3.bf16.msra.mxu1 %v615_v7 }
  0x18   :  { %574 = vmatprep.subr.bf16.mxu0 %v616_v8  ;;  %600 = vmatprep.subr.bf16.mxu1 %v616_v8 }
  0x1b   :  { %575 = vmatpush3.bf16.msra.mxu0 %v616_v8  ;;  %608 = vmatpush3.bf16.msra.mxu1 %v616_v8 }
  0x1c   :  { %576 = vmatprep.subr.bf16.mxu0 %v617_v9  ;;  %601 = vmatprep.subr.bf16.mxu1 %v617_v9 }
  0x1f   :  { %577 = vmatpush3.bf16.msra.mxu0 %v617_v9  ;;  %609 = vmatpush3.bf16.msra.mxu1 %v617_v9 }
  0x22   :  { %579 = vmatmul.mubr.bf16.vlgmr.msra.gmra.mrb[0].mxu0 %v620_v10  ;;  %587 = vmatmul.mubr.bf16.vlgmr.msra.gmra.mrb[0].mxu1 %v621_v11 }
  0x23   :  { %582 = vmatprep.mubr.bf16.mxu0 %v622_v12  ;;  %590 = vmatprep.mubr.bf16.mxu1 %v623_v13 }
  0x2a   :  { %583 = vmatmul.mubr.bf16.gmra.mrb[4].mxu0 %v624_v14  ;;  %591 = vmatmul.mubr.bf16.gmra.mrb[4].mxu1 %v625_v15 }
  0xf5   :  { %v580_v17 = vpop.f32.mrb[0].mxu0  ;;  %v588_v18 = vpop.f32.mrb[0].mxu1 }
  0xf6   :  { %v336_v19 = vadd.f32 %v580_v17, %v466_v16  ;;  %v344_v20 = vadd.f32 %v588_v18, %v466_v16  ;;  %v213_v21 = vpop.f32.mrb[1].mxu0  ;;  %v245_v22 = vpop.f32.mrb[1].mxu1 }
  0xf7   :  { %v334_v23 = vadd.f32 %v466_v16, %v213_v21  ;;  %v342_v24 = vadd.f32 %v466_v16, %v245_v22  ;;  %v581_v25 = vpop.f32.mrb[2].mxu0  ;;  %v589_v26 = vpop.f32.mrb[2].mxu1 }
  0xf8   :  { %v337_v27 = vadd.f32 %v581_v25, %v466_v16  ;;  %v345_v28 = vadd.f32 %v589_v26, %v466_v16  ;;  %v216_v29 = vpop.f32.mrb[3].mxu0  ;;  %v248_v30 = vpop.f32.mrb[3].mxu1  ;;  %v352_v33 = vmax.f32 %v336_v19, 0.0  ;;  %v360_v34 = vmax.f32 %v344_v20, 0.0 }
  0xf9   :  { %v335_v31 = vadd.f32 %v466_v16, %v216_v29  ;;  %v343_v32 = vadd.f32 %v466_v16, %v248_v30  ;;  %v350_v37 = vmax.f32 %v334_v23, 0.0  ;;  %v358_v38 = vmax.f32 %v342_v24, 0.0 }
  0xfa   :  { %v353_v35 = vmax.f32 %v337_v27, 0.0  ;;  %v361_v36 = vmax.f32 %v345_v28, 0.0 }
  0xfb   :  { %v351_v39 = vmax.f32 %v335_v31, 0.0  ;;  %v359_v40 = vmax.f32 %v343_v32, 0.0 }
  0xfc   :  { %v507_v41 = vpack.c.bf16 %v353_v35, %v352_v33  ;;  %v527_v42 = vpack.c.bf16 %v361_v36, %v360_v34 }
  0xfd   :  { %v502_v43 = vpack.c.bf16 %v351_v39, %v350_v37  ;;  %v522_v44 = vpack.c.bf16 %v359_v40, %v358_v38  ;;  %v584_v45 = vpop.f32.mrb[4].mxu0  ;;  %v592_v46 = vpop.f32.mrb[4].mxu1 }
  0xfe   :  { %539 = vst [vmem:[%s724_s3 + $0x8] sm:$0xff] %v507_v41   ;;  %543 = vst [vmem:[%s724_s3 + $0x28] sm:$0xff] %v527_v42   ;;  %v340_v47 = vadd.f32 %v584_v45, %v466_v16  ;;  %v348_v48 = vadd.f32 %v592_v46, %v466_v16  ;;  %v229_v49 = vpop.f32.mrb[5].mxu0  ;;  %v261_v50 = vpop.f32.mrb[5].mxu1 }
  0xff   :  { %503 = vst [vmem:[%s724_s3] sm:$0xff] %v502_v43   ;;  %542 = vst [vmem:[%s724_s3 + $0x20] sm:$0xff] %v522_v44   ;;  %v338_v51 = vadd.f32 %v466_v16, %v229_v49  ;;  %v346_v52 = vadd.f32 %v466_v16, %v261_v50  ;;  %v585_v53 = vpop.f32.mrb[6].mxu0  ;;  %v593_v54 = vpop.f32.mrb[6].mxu1 }
 0x100   :  { %v341_v55 = vadd.f32 %v585_v53, %v466_v16  ;;  %v349_v56 = vadd.f32 %v593_v54, %v466_v16  ;;  %v232_v57 = vpop.f32.mrb[7].mxu0  ;;  %v264_v58 = vpop.f32.mrb[7].mxu1  ;;  %v356_v61 = vmax.f32 %v340_v47, 0.0  ;;  %v364_v62 = vmax.f32 %v348_v48, 0.0 }
 0x101   :  { %v339_v59 = vadd.f32 %v466_v16, %v232_v57  ;;  %v347_v60 = vadd.f32 %v466_v16, %v264_v58  ;;  %v354_v1 = vmax.f32 %v338_v51, 0.0  ;;  %v362_v2 = vmax.f32 %v346_v52, 0.0 }
 0x102   :  { %v357_v63 = vmax.f32 %v341_v55, 0.0  ;;  %v365_v0 = vmax.f32 %v349_v56, 0.0 }
 0x103   :  { %v355_v3 = vmax.f32 %v339_v59, 0.0  ;;  %v363_v4 = vmax.f32 %v347_v60, 0.0 }
 0x104   :  { %v517_v5 = vpack.c.bf16 %v357_v63, %v356_v61  ;;  %v537_v6 = vpack.c.bf16 %v365_v0, %v364_v62 }
 0x105   :  { %v512_v7 = vpack.c.bf16 %v355_v3, %v354_v1  ;;  %v532_v8 = vpack.c.bf16 %v363_v4, %v362_v2 }
 0x106   :  { %541 = vst [vmem:[%s724_s3 + $0x18] sm:$0xff] %v517_v5   ;;  %545 = vst [vmem:[%s724_s3 + $0x38] sm:$0xff] %v537_v6  }
 0x107   :  { %540 = vst [vmem:[%s724_s3 + $0x10] sm:$0xff] %v512_v7   ;;  %544 = vst [vmem:[%s724_s3 + $0x30] sm:$0xff] %v532_v8  }

// kernel: simple_gcn_forward.4
= control target key start
LH: loop header
LB: loop body
LE: loop exit
PB: predicated region body
PF: predicated region fallthrough
CT: control target
= control target key end

     0   :  { %s705_s1 = inlined_call_operand.vmem [shape: bf16[128,128], index: 1, kind: input, shape index: {}]   ;;  %s706_s0 = inlined_call_operand.vmem [shape: bf16[128,128], index: 0, kind: input, shape index: {}]   ;;  %s707_s2 = inlined_call_operand.vmem [shape: f32[1,128], index: 2, kind: input, shape index: {}]   ;;  %s708_s3 = inlined_call_operand.vmem [shape: bf16[128,128], index: 3, kind: output, shape index: {}]  }
   0x1   :  { %v594_v0 = vld [vmem:[%s705_s1] sm:$0xff]   ;;  %v595_v1 = vld [vmem:[%s705_s1 + $0x8] sm:$0xff]   ;;  %v596_v2 = vld [vmem:[%s705_s1 + $0x10] sm:$0xff]  }
   0x2   :  { %546 = vmatprep.subr.bf16.mxu0 %v594_v0  ;;  %578 = vmatprep.subr.bf16.mxu1 %v594_v0  ;;  %v597_v3 = vld [vmem:[%s705_s1 + $0x18] sm:$0xff]   ;;  %v602_v4 = vld [vmem:[%s706_s0] sm:$0xff]   ;;  %v599_v7 = vld [vmem:[%s705_s1 + $0x28] sm:$0xff]  }
   0x3   :  { %547 = vmatpush3.bf16.msra.mxu0 %v594_v0  ;;  %586 = vmatpush3.bf16.msra.mxu1 %v594_v0  ;;  %v603_v5 = vld [vmem:[%s706_s0 + $0x20] sm:$0xff]   ;;  %v600_v8 = vld [vmem:[%s705_s1 + $0x30] sm:$0xff]   ;;  %v601_v9 = vld [vmem:[%s705_s1 + $0x38] sm:$0xff]  }
   0x4   :  { %548 = vmatprep.subr.bf16.mxu0 %v595_v1  ;;  %579 = vmatprep.subr.bf16.mxu1 %v595_v1  ;;  %v598_v6 = vld [vmem:[%s705_s1 + $0x20] sm:$0xff]   ;;  %v604_v10 = vld [vmem:[%s706_s0 + $0x8] sm:$0xff]   ;;  %v606_v12 = vld [vmem:[%s706_s0 + $0x10] sm:$0xff]  }
   0x5   :  { %562 = vmatprep.mubr.bf16.mxu0 %v602_v4  ;;  %570 = vmatprep.mubr.bf16.mxu1 %v603_v5  ;;  %v605_v11 = vld [vmem:[%s706_s0 + $0x28] sm:$0xff]   ;;  %v607_v13 = vld [vmem:[%s706_s0 + $0x30] sm:$0xff]   ;;  %v608_v14 = vld [vmem:[%s706_s0 + $0x18] sm:$0xff]  }
   0x6   :  { %v609_v15 = vld [vmem:[%s706_s0 + $0x38] sm:$0xff]   ;;  %v450_v17 = vld [vmem:[%s707_s2] ss:$0 sm:$0xff] }
   0x7   :  { %549 = vmatpush3.bf16.msra.mxu0 %v595_v1  ;;  %587 = vmatpush3.bf16.msra.mxu1 %v595_v1 }
   0x8   :  { %550 = vmatprep.subr.bf16.mxu0 %v596_v2  ;;  %580 = vmatprep.subr.bf16.mxu1 %v596_v2 }
   0xb   :  { %551 = vmatpush3.bf16.msra.mxu0 %v596_v2  ;;  %588 = vmatpush3.bf16.msra.mxu1 %v596_v2 }
   0xc   :  { %552 = vmatprep.subr.bf16.mxu0 %v597_v3  ;;  %581 = vmatprep.subr.bf16.mxu1 %v597_v3 }
   0xf   :  { %553 = vmatpush3.bf16.msra.mxu0 %v597_v3  ;;  %589 = vmatpush3.bf16.msra.mxu1 %v597_v3 }
  0x10   :  { %554 = vmatprep.subr.bf16.mxu0 %v598_v6  ;;  %582 = vmatprep.subr.bf16.mxu1 %v598_v6 }
  0x13   :  { %555 = vmatpush3.bf16.msra.mxu0 %v598_v6  ;;  %590 = vmatpush3.bf16.msra.mxu1 %v598_v6 }
  0x14   :  { %556 = vmatprep.subr.bf16.mxu0 %v599_v7  ;;  %583 = vmatprep.subr.bf16.mxu1 %v599_v7 }
  0x17   :  { %557 = vmatpush3.bf16.msra.mxu0 %v599_v7  ;;  %591 = vmatpush3.bf16.msra.mxu1 %v599_v7 }
  0x18   :  { %558 = vmatprep.subr.bf16.mxu0 %v600_v8  ;;  %584 = vmatprep.subr.bf16.mxu1 %v600_v8 }
  0x1b   :  { %559 = vmatpush3.bf16.msra.mxu0 %v600_v8  ;;  %592 = vmatpush3.bf16.msra.mxu1 %v600_v8 }
  0x1c   :  { %560 = vmatprep.subr.bf16.mxu0 %v601_v9  ;;  %585 = vmatprep.subr.bf16.mxu1 %v601_v9 }
  0x1f   :  { %561 = vmatpush3.bf16.msra.mxu0 %v601_v9  ;;  %593 = vmatpush3.bf16.msra.mxu1 %v601_v9 }
  0x22   :  { %563 = vmatmul.mubr.bf16.vlgmr.msra.gmra.mrb[0].mxu0 %v604_v10  ;;  %571 = vmatmul.mubr.bf16.vlgmr.msra.gmra.mrb[0].mxu1 %v605_v11 }
  0x23   :  { %566 = vmatprep.mubr.bf16.mxu0 %v606_v12  ;;  %574 = vmatprep.mubr.bf16.mxu1 %v607_v13 }
  0x2a   :  { %567 = vmatmul.mubr.bf16.gmra.mrb[4].mxu0 %v608_v14  ;;  %575 = vmatmul.mubr.bf16.gmra.mrb[4].mxu1 %v609_v15 }
  0xf5   :  { %v564_v16 = vpop.f32.mrb[0].mxu0  ;;  %v572_v18 = vpop.f32.mrb[0].mxu1 }
  0xf6   :  { %v213_v19 = vpop.f32.mrb[1].mxu0  ;;  %v245_v20 = vpop.f32.mrb[1].mxu1  ;;  %v336_v23 = vadd.f32 %v564_v16, %v450_v17  ;;  %v344_v24 = vadd.f32 %v572_v18, %v450_v17 }
  0xf7   :  { %v565_v21 = vpop.f32.mrb[2].mxu0  ;;  %v573_v22 = vpop.f32.mrb[2].mxu1  ;;  %v334_v29 = vadd.f32 %v450_v17, %v213_v19  ;;  %v342_v30 = vadd.f32 %v450_v17, %v245_v20 }
  0xf8   :  { %v337_v25 = vadd.f32 %v565_v21, %v450_v17  ;;  %v345_v26 = vadd.f32 %v573_v22, %v450_v17  ;;  %v216_v27 = vpop.f32.mrb[3].mxu0  ;;  %v248_v28 = vpop.f32.mrb[3].mxu1 }
  0xf9   :  { %v335_v31 = vadd.f32 %v450_v17, %v216_v27  ;;  %v343_v32 = vadd.f32 %v450_v17, %v248_v28 }
  0xfa   :  { %v491_v33 = vpack.c.bf16 %v337_v25, %v336_v23  ;;  %v511_v34 = vpack.c.bf16 %v345_v26, %v344_v24 }
  0xfb   :  { %v486_v35 = vpack.c.bf16 %v335_v31, %v334_v29  ;;  %v506_v36 = vpack.c.bf16 %v343_v32, %v342_v30 }
  0xfc   :  { %523 = vst [vmem:[%s708_s3 + $0x8] sm:$0xff] %v491_v33   ;;  %527 = vst [vmem:[%s708_s3 + $0x28] sm:$0xff] %v511_v34  }
  0xfd   :  { %487 = vst [vmem:[%s708_s3] sm:$0xff] %v486_v35   ;;  %526 = vst [vmem:[%s708_s3 + $0x20] sm:$0xff] %v506_v36   ;;  %v568_v37 = vpop.f32.mrb[4].mxu0  ;;  %v576_v38 = vpop.f32.mrb[4].mxu1 }
  0xfe   :  { %v229_v39 = vpop.f32.mrb[5].mxu0  ;;  %v261_v40 = vpop.f32.mrb[5].mxu1  ;;  %v340_v43 = vadd.f32 %v568_v37, %v450_v17  ;;  %v348_v44 = vadd.f32 %v576_v38, %v450_v17 }
  0xff   :  { %v569_v41 = vpop.f32.mrb[6].mxu0  ;;  %v577_v42 = vpop.f32.mrb[6].mxu1  ;;  %v338_v49 = vadd.f32 %v450_v17, %v229_v39  ;;  %v346_v50 = vadd.f32 %v450_v17, %v261_v40 }
 0x100   :  { %v341_v45 = vadd.f32 %v569_v41, %v450_v17  ;;  %v349_v46 = vadd.f32 %v577_v42, %v450_v17  ;;  %v232_v47 = vpop.f32.mrb[7].mxu0  ;;  %v264_v48 = vpop.f32.mrb[7].mxu1 }
 0x101   :  { %v339_v51 = vadd.f32 %v450_v17, %v232_v47  ;;  %v347_v52 = vadd.f32 %v450_v17, %v264_v48 }
 0x102   :  { %v501_v53 = vpack.c.bf16 %v341_v45, %v340_v43  ;;  %v521_v54 = vpack.c.bf16 %v349_v46, %v348_v44 }
 0x103   :  { %v496_v55 = vpack.c.bf16 %v339_v51, %v338_v49  ;;  %v516_v56 = vpack.c.bf16 %v347_v52, %v346_v50 }
 0x104   :  { %525 = vst [vmem:[%s708_s3 + $0x18] sm:$0xff] %v501_v53   ;;  %529 = vst [vmem:[%s708_s3 + $0x38] sm:$0xff] %v521_v54  }
 0x105   :  { %524 = vst [vmem:[%s708_s3 + $0x10] sm:$0xff] %v496_v55   ;;  %528 = vst [vmem:[%s708_s3 + $0x30] sm:$0xff] %v516_v56  }

// kernel: simple_gcn_forward.7
= control target key start
LH: loop header
LB: loop body
LE: loop exit
PB: predicated region body
PF: predicated region fallthrough
CT: control target
= control target key end

     0   :  { %s586_s1 = inlined_call_operand.vmem [shape: bf16[128,128], index: 1, kind: input, shape index: {}]   ;;  %s587_s0 = inlined_call_operand.vmem [shape: bf16[128,128], index: 0, kind: input, shape index: {}]   ;;  %s588_s2 = inlined_call_operand.vmem [shape: f32[1,128], index: 2, kind: input, shape index: {}]   ;;  %s589_s3 = inlined_call_operand.vmem [shape: f32[128,128], index: 3, kind: output, shape index: {}]  }
   0x1   :  { %v451_v0 = vld [vmem:[%s586_s1] sm:$0xff]   ;;  %v452_v1 = vld [vmem:[%s586_s1 + $0x8] sm:$0xff]   ;;  %v453_v2 = vld [vmem:[%s586_s1 + $0x10] sm:$0xff]  }
   0x2   :  { %403 = vmatprep.subr.bf16.mxu0 %v451_v0  ;;  %435 = vmatprep.subr.bf16.mxu1 %v451_v0  ;;  %v454_v3 = vld [vmem:[%s586_s1 + $0x18] sm:$0xff]   ;;  %v459_v4 = vld [vmem:[%s587_s0] sm:$0xff]   ;;  %v456_v7 = vld [vmem:[%s586_s1 + $0x28] sm:$0xff]  }
   0x3   :  { %404 = vmatpush3.bf16.msra.mxu0 %v451_v0  ;;  %443 = vmatpush3.bf16.msra.mxu1 %v451_v0  ;;  %v460_v5 = vld [vmem:[%s587_s0 + $0x20] sm:$0xff]   ;;  %v457_v8 = vld [vmem:[%s586_s1 + $0x30] sm:$0xff]   ;;  %v458_v9 = vld [vmem:[%s586_s1 + $0x38] sm:$0xff]  }
   0x4   :  { %405 = vmatprep.subr.bf16.mxu0 %v452_v1  ;;  %436 = vmatprep.subr.bf16.mxu1 %v452_v1  ;;  %v455_v6 = vld [vmem:[%s586_s1 + $0x20] sm:$0xff]   ;;  %v461_v10 = vld [vmem:[%s587_s0 + $0x8] sm:$0xff]   ;;  %v463_v12 = vld [vmem:[%s587_s0 + $0x10] sm:$0xff]  }
   0x5   :  { %419 = vmatprep.mubr.bf16.mxu0 %v459_v4  ;;  %427 = vmatprep.mubr.bf16.mxu1 %v460_v5  ;;  %v462_v11 = vld [vmem:[%s587_s0 + $0x28] sm:$0xff]   ;;  %v464_v13 = vld [vmem:[%s587_s0 + $0x30] sm:$0xff]   ;;  %v465_v14 = vld [vmem:[%s587_s0 + $0x18] sm:$0xff]  }
   0x6   :  { %v466_v15 = vld [vmem:[%s587_s0 + $0x38] sm:$0xff]   ;;  %v386_v16 = vld [vmem:[%s588_s2] ss:$0 sm:$0xff] }
   0x7   :  { %406 = vmatpush3.bf16.msra.mxu0 %v452_v1  ;;  %444 = vmatpush3.bf16.msra.mxu1 %v452_v1 }
   0x8   :  { %407 = vmatprep.subr.bf16.mxu0 %v453_v2  ;;  %437 = vmatprep.subr.bf16.mxu1 %v453_v2 }
   0xb   :  { %408 = vmatpush3.bf16.msra.mxu0 %v453_v2  ;;  %445 = vmatpush3.bf16.msra.mxu1 %v453_v2 }
   0xc   :  { %409 = vmatprep.subr.bf16.mxu0 %v454_v3  ;;  %438 = vmatprep.subr.bf16.mxu1 %v454_v3 }
   0xf   :  { %410 = vmatpush3.bf16.msra.mxu0 %v454_v3  ;;  %446 = vmatpush3.bf16.msra.mxu1 %v454_v3 }
  0x10   :  { %411 = vmatprep.subr.bf16.mxu0 %v455_v6  ;;  %439 = vmatprep.subr.bf16.mxu1 %v455_v6 }
  0x13   :  { %412 = vmatpush3.bf16.msra.mxu0 %v455_v6  ;;  %447 = vmatpush3.bf16.msra.mxu1 %v455_v6 }
  0x14   :  { %413 = vmatprep.subr.bf16.mxu0 %v456_v7  ;;  %440 = vmatprep.subr.bf16.mxu1 %v456_v7 }
  0x17   :  { %414 = vmatpush3.bf16.msra.mxu0 %v456_v7  ;;  %448 = vmatpush3.bf16.msra.mxu1 %v456_v7 }
  0x18   :  { %415 = vmatprep.subr.bf16.mxu0 %v457_v8  ;;  %441 = vmatprep.subr.bf16.mxu1 %v457_v8 }
  0x1b   :  { %416 = vmatpush3.bf16.msra.mxu0 %v457_v8  ;;  %449 = vmatpush3.bf16.msra.mxu1 %v457_v8 }
  0x1c   :  { %417 = vmatprep.subr.bf16.mxu0 %v458_v9  ;;  %442 = vmatprep.subr.bf16.mxu1 %v458_v9 }
  0x1f   :  { %418 = vmatpush3.bf16.msra.mxu0 %v458_v9  ;;  %450 = vmatpush3.bf16.msra.mxu1 %v458_v9 }
  0x22   :  { %420 = vmatmul.mubr.bf16.vlgmr.msra.gmra.mrb[0].mxu0 %v461_v10  ;;  %428 = vmatmul.mubr.bf16.vlgmr.msra.gmra.mrb[0].mxu1 %v462_v11 }
  0x23   :  { %423 = vmatprep.mubr.bf16.mxu0 %v463_v12  ;;  %431 = vmatprep.mubr.bf16.mxu1 %v464_v13 }
  0x2a   :  { %424 = vmatmul.mubr.bf16.gmra.mrb[4].mxu0 %v465_v14  ;;  %432 = vmatmul.mubr.bf16.gmra.mrb[4].mxu1 %v466_v15 }
  0xf5   :  { %v421_v17 = vpop.f32.mrb[0].mxu0  ;;  %v429_v18 = vpop.f32.mrb[0].mxu1 }
  0xf6   :  { %v336_v19 = vadd.f32 %v421_v17, %v386_v16  ;;  %v344_v20 = vadd.f32 %v429_v18, %v386_v16  ;;  %v213_v21 = vpop.f32.mrb[1].mxu0  ;;  %v245_v22 = vpop.f32.mrb[1].mxu1 }
  0xf7   :  { %v334_v23 = vadd.f32 %v386_v16, %v213_v21  ;;  %v342_v24 = vadd.f32 %v386_v16, %v245_v22  ;;  %v422_v25 = vpop.f32.mrb[2].mxu0  ;;  %v430_v26 = vpop.f32.mrb[2].mxu1 }
  0xf8   :  { %352 = vst [vmem:[%s589_s3 + $0x10] sm:$0xff] %v336_v19  ;;  %360 = vst [vmem:[%s589_s3 + $0x50] sm:$0xff] %v344_v20  ;;  %v337_v27 = vadd.f32 %v422_v25, %v386_v16  ;;  %v345_v28 = vadd.f32 %v430_v26, %v386_v16  ;;  %v216_v29 = vpop.f32.mrb[3].mxu0  ;;  %v248_v30 = vpop.f32.mrb[3].mxu1 }
  0xf9   :  { %350 = vst [vmem:[%s589_s3] sm:$0xff] %v334_v23  ;;  %358 = vst [vmem:[%s589_s3 + $0x40] sm:$0xff] %v342_v24  ;;  %v335_v31 = vadd.f32 %v386_v16, %v216_v29  ;;  %v343_v32 = vadd.f32 %v386_v16, %v248_v30 }
  0xfa   :  { %353 = vst [vmem:[%s589_s3 + $0x18] sm:$0xff] %v337_v27  ;;  %361 = vst [vmem:[%s589_s3 + $0x58] sm:$0xff] %v345_v28 }
  0xfb   :  { %351 = vst [vmem:[%s589_s3 + $0x8] sm:$0xff] %v335_v31  ;;  %359 = vst [vmem:[%s589_s3 + $0x48] sm:$0xff] %v343_v32 }
  0xfd   :  { %v425_v33 = vpop.f32.mrb[4].mxu0  ;;  %v433_v34 = vpop.f32.mrb[4].mxu1 }
  0xfe   :  { %v340_v35 = vadd.f32 %v425_v33, %v386_v16  ;;  %v348_v36 = vadd.f32 %v433_v34, %v386_v16  ;;  %v229_v37 = vpop.f32.mrb[5].mxu0  ;;  %v261_v38 = vpop.f32.mrb[5].mxu1 }
  0xff   :  { %v338_v39 = vadd.f32 %v386_v16, %v229_v37  ;;  %v346_v40 = vadd.f32 %v386_v16, %v261_v38  ;;  %v426_v41 = vpop.f32.mrb[6].mxu0  ;;  %v434_v42 = vpop.f32.mrb[6].mxu1 }
 0x100   :  { %356 = vst [vmem:[%s589_s3 + $0x30] sm:$0xff] %v340_v35  ;;  %364 = vst [vmem:[%s589_s3 + $0x70] sm:$0xff] %v348_v36  ;;  %v341_v43 = vadd.f32 %v426_v41, %v386_v16  ;;  %v349_v44 = vadd.f32 %v434_v42, %v386_v16  ;;  %v232_v45 = vpop.f32.mrb[7].mxu0  ;;  %v264_v46 = vpop.f32.mrb[7].mxu1 }
 0x101   :  { %354 = vst [vmem:[%s589_s3 + $0x20] sm:$0xff] %v338_v39  ;;  %362 = vst [vmem:[%s589_s3 + $0x60] sm:$0xff] %v346_v40  ;;  %v339_v47 = vadd.f32 %v386_v16, %v232_v45  ;;  %v347_v48 = vadd.f32 %v386_v16, %v264_v46 }
 0x102   :  { %357 = vst [vmem:[%s589_s3 + $0x38] sm:$0xff] %v341_v43  ;;  %365 = vst [vmem:[%s589_s3 + $0x78] sm:$0xff] %v349_v44 }
 0x103   :  { %355 = vst [vmem:[%s589_s3 + $0x28] sm:$0xff] %v339_v47  ;;  %363 = vst [vmem:[%s589_s3 + $0x68] sm:$0xff] %v347_v48 }

</bundles_post_ra>
